<compile_context>
chip_gen: v6e
topology: v6e:2x2x1
jax: 0.10.0
libtpu: 0.0.40
codegen_flags: <defaults>
</compile_context>

<pallas_src>
import jax
import jax.numpy as jnp
from jax import lax
from jax.experimental import pallas as pl
from jax.experimental.pallas import tpu as pltpu


def get_temperature(epoch):
    return 30.0 - 2.9 * epoch if epoch < 10 else 1.0


# ---------------------------------------------------------------------------
# fused dynamic 3x3x3 "same" conv kernel:
# one (Co, KDp) x (KDp, THW_tile) bf16 matmul + f32 bias add per grid step.
# ---------------------------------------------------------------------------
def _dyn_conv_kernel(slab_ref, w_ref, b_ref, o_ref):
    """slab_ref : (1, KDp, Tt) bf16   pre-transposed im2col slab tile (lane-dense)
       w_ref    : (1, Co, KDp) bf16   per-sample phi-mixed conv weight rows
       b_ref    : (1, Co, 1)   f32    per-sample dynamic bias
       o_ref    : (1, Co, Tt)  f32    lane-dense output tile (Co sublanes x Tt lanes)
    """
    y = jnp.dot(w_ref[0], slab_ref[0], preferred_element_type=jnp.float32)
    o_ref[0] = (y + b_ref[0]).astype(o_ref.dtype)


def dynamic_conv3d(slab, w_dyn, b_dyn, *, thw_tile=8192):
    """slab:(N,KDp,THW) bf16, w_dyn:(N,Co,KDp) bf16, b_dyn:(N,Co,1) f32 -> (N,Co,THW) f32."""
    N, KDp, THW = slab.shape
    Co = w_dyn.shape[1]
    tile = thw_tile if THW % thw_tile == 0 else THW     # small problems: 1 tile/sample
    grid = (N, THW // tile)
    return pl.pallas_call(
        _dyn_conv_kernel,
        out_shape=jax.ShapeDtypeStruct((N, Co, THW), jnp.float32),
        grid=grid,
        in_specs=[
            pl.BlockSpec((1, KDp, tile), lambda n, s: (n, 0, s)),   # im2col^T slab tile
            pl.BlockSpec((1, Co, KDp), lambda n, s: (n, 0, 0)),     # per-sample weights
            pl.BlockSpec((1, Co, 1), lambda n, s: (n, 0, 0)),       # per-sample bias
        ],
        out_specs=pl.BlockSpec((1, Co, tile), lambda n, s: (n, 0, s)),
        compiler_params=pltpu.CompilerParams(
            dimension_semantics=("parallel", "parallel"),
            vmem_limit_bytes=32 * 1024 * 1024),
    )(slab, w_dyn, b_dyn)


# ---------------------------------------------------------------------------
# wrapper-side im2col (review-sanctioned at these sizes: ~1 MiB bf16 in HBM)
# column order = ((kt,kh,kw) major, Ci minor); result is transposed so the
# kernel sees a lane-dense (KD_pad, T*H*W) slab.
# ---------------------------------------------------------------------------
def _im2col_slab_t(x_cl_bf16, T, H, W, Ci, KDp):
    N = x_cl_bf16.shape[0]
    xp = jnp.pad(x_cl_bf16, ((0, 0), (1, 1), (1, 1), (1, 1), (0, 0)))   # zero "same" pad
    taps = []
    for dt in range(3):
        for dh in range(3):
            for dw in range(3):
                taps.append(xp[:, dt:dt + T, dh:dh + H, dw:dw + W, :])
    col = jnp.stack(taps, axis=-2)                         # (N, T, H, W, 27, Ci)
    col = col.reshape(N, T * H * W, 27 * Ci)               # (N, THW, KD)
    col = jnp.transpose(col, (0, 2, 1))                    # (N, KD, THW)
    return jnp.pad(col, ((0, 0), (0, KDp - 27 * Ci), (0, 0)))


# ---------------------------------------------------------------------------
# tiny squeeze-expand gate: plain XLA per perf review (negligible compute)
# ---------------------------------------------------------------------------
def squeeze_expand_gate(std_x_nchw, gp, tau):
    h1 = jax.nn.relu(lax.conv(std_x_nchw, gp["conv1_w"], (1, 1), "VALID")
                     + gp["conv1_b"][None, :, None, None])
    h2 = jax.nn.relu(lax.conv(h1, gp["conv2_w"], (1, 1), "VALID")
                     + gp["conv2_b"][None, :, None, None])
    g = jnp.max(h2, axis=(2, 3))                           # AdaptiveMaxPool2d(1)+Squeeze
    logits = g @ gp["lin_w"] + gp["lin_b"]
    return jax.nn.softmax(logits / tau, axis=1)


# ---------------------------------------------------------------------------
# forward (matches ShapeDynamicConv.forward)
# ---------------------------------------------------------------------------
def shape_dynamic_conv_forward(x_ncdhw, params, epochs_num=0):
    x = x_ncdhw.astype(jnp.float32)
    N, Ci, T, H, W = x.shape
    weights = params["weights"]                            # (K, Co, Ci, 3, 3, 3)
    biases = params["biases"]                              # (K, Co)
    K, Co = biases.shape
    tau = get_temperature(epochs_num)

    # gate: std over T (unbiased, = torch.std), squeeze-expand, softmax(/tau)
    # TODO(synk): torch.std over T produces NaN for T==1; guard if that case arises.
    std_x = jnp.std(x, axis=2, ddof=1)                     # (N, Ci, H, W)
    phi = squeeze_expand_gate(std_x, params["gate"], tau)  # (N, K)

    # per-sample dynamic weights / bias: exact f32 einsum on ~K*Co*Ci*27 floats
    dyn_w = jnp.einsum("nk,kabcde->nabcde", phi, weights)  # (N, Co, Ci, 3, 3, 3)
    dyn_b = (phi @ biases).reshape(N, Co, 1)               # (N, Co, 1) f32

    # weight rows in im2col column order ((kt,kh,kw) major, Ci minor), bf16, pad to KDp
    KD = 27 * Ci
    KDp = ((KD + 127) // 128) * 128
    w_rows = jnp.transpose(dyn_w, (0, 1, 3, 4, 5, 2)).reshape(N, Co, KD)
    w_rows = jnp.pad(w_rows, ((0, 0), (0, 0), (0, KDp - KD))).astype(jnp.bfloat16)

    # lane-dense, pre-transposed bf16 im2col slab (N, KDp, T*H*W)
    x_cl = jnp.transpose(x, (0, 2, 3, 4, 1)).astype(jnp.bfloat16)   # (N, T, H, W, Ci)
    slab = _im2col_slab_t(x_cl, T, H, W, Ci, KDp)

    y = dynamic_conv3d(slab, w_rows, dyn_b)                # (N, Co, T*H*W) f32
    return y.reshape(N, Co, T, H, W)


# ---------------------------------------------------------------------------
# pure-JAX (XLA) reference of the PyTorch forward, for a loose numeric check
# (Pallas path streams activations/weights in bf16 -> loose tolerance)
# ---------------------------------------------------------------------------
def reference_forward(x, params, epochs_num=0):
    x = x.astype(jnp.float32)
    tau = get_temperature(epochs_num)
    std_x = jnp.std(x, axis=2, ddof=1)
    phi = squeeze_expand_gate(std_x, params["gate"], tau)
    dyn_w = jnp.einsum("nk,kabcde->nabcde", phi, params["weights"])  # (N,Co,Ci,3,3,3)
    dyn_b = phi @ params["biases"]                                   # (N, Co)
    conv = jax.vmap(lambda xi, wi: lax.conv(xi[None], wi, (1, 1, 1), "SAME"))(x, dyn_w)
    return conv[:, 0] + dyn_b[:, :, None, None, None]


# ---------------------------------------------------------------------------
# deterministic parameter init (shapes match the PyTorch module __init__)
# ---------------------------------------------------------------------------
def init_params(key, input_dim, dims, num_weights):
    ks = jax.random.split(key, 7)
    fan_in = input_dim * 27
    return {
        "weights": jax.random.normal(ks[0], (num_weights, dims, input_dim, 3, 3, 3),
                                     jnp.float32) * (2.0 / fan_in) ** 0.5,
        "biases": jax.random.normal(ks[1], (num_weights, dims), jnp.float32),
        "gate": {
            "conv1_w": jax.random.normal(ks[2], (16, input_dim, 5, 5), jnp.float32)
                       * (2.0 / (input_dim * 25)) ** 0.5,
            "conv1_b": jax.random.normal(ks[3], (16,), jnp.float32) * 0.01,
            "conv2_w": jax.random.normal(ks[4], (32, 16, 5, 5), jnp.float32)
                       * (2.0 / (16 * 25)) ** 0.5,
            "conv2_b": jax.random.normal(ks[5], (32,), jnp.float32) * 0.01,
            "lin_w": jax.random.normal(ks[6], (32, num_weights), jnp.float32)
                     * (1.0 / 32) ** 0.5,
            "lin_b": jnp.zeros((num_weights,), jnp.float32),
        },
    }


# ---------------------------------------------------------------------------
if __name__ == "__main__":
    key = jax.random.PRNGKey(0)
    kx, kp = jax.random.split(key)

    # ShapeDynamicConv(input_dim=4, dims=8, num_weights=4)
    N, Ci, T, H, W = 2, 4, 8, 16, 16
    dims, num_weights = 8, 4
    x = jax.random.normal(kx, (N, Ci, T, H, W), jnp.float32)
    params = init_params(kp, input_dim=Ci, dims=dims, num_weights=num_weights)

    fwd = jax.jit(lambda xx: shape_dynamic_conv_forward(xx, params, epochs_num=0))
    out = fwd(x)
    jax.block_until_ready(out)

    assert out.shape == (N, dims, T, H, W), out.shape
    assert out.dtype == jnp.float32
    assert bool(jnp.all(jnp.isfinite(out)))

    ref = reference_forward(x, params, epochs_num=0)
    max_err = float(jnp.max(jnp.abs(out - ref)))
    assert max_err < 0.1, f"max abs error vs reference too large: {max_err}"

    print("KERNEL_OK")
</pallas_src>

<mosaic_0001>
module attributes {stable_mosaic.version = 11 : i64} {
  func.func @_dyn_conv_kernel(%arg0: i32, %arg1: i32, %arg2: memref<1x128x2048xbf16, #tpu.memory_space<vmem>>, %arg3: memref<1x8x128xbf16, #tpu.memory_space<vmem>>, %arg4: memref<1x8x1xf32, #tpu.memory_space<vmem>>, %arg5: memref<1x8x2048xf32, #tpu.memory_space<vmem>>) attributes {dimension_semantics = [#tpu.dimension_semantics<parallel>, #tpu.dimension_semantics<parallel>], iteration_bounds = array<i64: 2, 1>, scalar_prefetch = 0 : i64, scratch_operands = 0 : i64, tpu.core_type = #tpu.core_type<tc>, window_params = [{transform_indices = @transform_0, window_bounds = array<i64: 1, 128, 2048>}, {transform_indices = @transform_1, window_bounds = array<i64: 1, 8, 128>}, {transform_indices = @transform_2, window_bounds = array<i64: 1, 8, 1>}, {transform_indices = @transform_3, window_bounds = array<i64: 1, 8, 2048>}]} {
    %c0 = arith.constant 0 : index
    %c0_0 = arith.constant 0 : index
    %c0_1 = arith.constant 0 : index
    %0 = vector.load %arg3[%c0, %c0_0, %c0_1] : memref<1x8x128xbf16, #tpu.memory_space<vmem>>, vector<1x8x128xbf16>
    %1 = vector.shape_cast %0 : vector<1x8x128xbf16> to vector<8x128xbf16>
    %c0_2 = arith.constant 0 : index
    %c0_3 = arith.constant 0 : index
    %c0_4 = arith.constant 0 : index
    %2 = vector.load %arg2[%c0_2, %c0_3, %c0_4] : memref<1x128x2048xbf16, #tpu.memory_space<vmem>>, vector<1x128x2048xbf16>
    %3 = vector.shape_cast %2 : vector<1x128x2048xbf16> to vector<128x2048xbf16>
    %cst = arith.constant dense<0.000000e+00> : vector<8x2048xf32>
    %4 = tpu.matmul %1, %3, %cst {dimension_numbers = #tpu.dot_dimension_numbers<[1], [0], [0], [1], [0, 0, 1, 1], [], []>} : vector<8x128xbf16>, vector<128x2048xbf16>, vector<8x2048xf32> -> vector<8x2048xf32>
    %c0_5 = arith.constant 0 : index
    %c0_6 = arith.constant 0 : index
    %c0_7 = arith.constant 0 : index
    %5 = vector.load %arg4[%c0_5, %c0_6, %c0_7] : memref<1x8x1xf32, #tpu.memory_space<vmem>>, vector<1x8x1xf32>
    %6 = vector.shape_cast %5 : vector<1x8x1xf32> to vector<8x1xf32>
    %7 = vector.broadcast %6 : vector<8x1xf32> to vector<8x2048xf32>
    %8 = arith.addf %4, %7 : vector<8x2048xf32>
    %c0_8 = arith.constant 0 : index
    %c0_9 = arith.constant 0 : index
    %c0_10 = arith.constant 0 : index
    %9 = vector.load %arg5[%c0_8, %c0_9, %c0_10] : memref<1x8x2048xf32, #tpu.memory_space<vmem>>, vector<1x8x2048xf32>
    %10 = vector.shape_cast %9 : vector<1x8x2048xf32> to vector<8x2048xf32>
    %11 = vector.shape_cast %8 : vector<8x2048xf32> to vector<1x8x2048xf32>
    tpu.vector_store %arg5[%c0_8, %c0_9, %c0_10], %11 {strides = array<i32>} : memref<1x8x2048xf32, #tpu.memory_space<vmem>>, vector<1x8x2048xf32>,
    return
  }
  func.func @transform_0(%arg0: i32, %arg1: i32) -> (i32, i32, i32) {
    %c0_i32 = arith.constant 0 : i32
    %c0_i32_0 = arith.constant 0 : i32
    return %arg0, %c0_i32, %arg1 : i32, i32, i32
  }
  func.func @transform_1(%arg0: i32, %arg1: i32) -> (i32, i32, i32) {
    %c0_i32 = arith.constant 0 : i32
    %c0_i32_0 = arith.constant 0 : i32
    %c0_i32_1 = arith.constant 0 : i32
    return %arg0, %c0_i32, %c0_i32_0 : i32, i32, i32
  }
  func.func @transform_2(%arg0: i32, %arg1: i32) -> (i32, i32, i32) {
    %c0_i32 = arith.constant 0 : i32
    %c0_i32_0 = arith.constant 0 : i32
    %c0_i32_1 = arith.constant 0 : i32
    return %arg0, %c0_i32, %c0_i32_0 : i32, i32, i32
  }
  func.func @transform_3(%arg0: i32, %arg1: i32) -> (i32, i32, i32) {
    %c0_i32 = arith.constant 0 : i32
    %c0_i32_0 = arith.constant 0 : i32
    return %arg0, %c0_i32, %arg1 : i32, i32, i32
  }
}

</mosaic_0001>

<bundles_post_ra>
// kernel: _lambda_.1
= control target key start
LH: loop header
LB: loop body
LE: loop exit
PB: predicated region body
PF: predicated region fallthrough
CT: control target
= control target key end

     0   :  { %s1689_s12 = smov 0   ;;  %s1691_s13 = smov 0   ;;  %s1901_s0 = inlined_call_operand.vmem [shape: bf16[2,128,2048], index: 0, kind: input, shape index: {}]   ;;  %s1902_s1 = inlined_call_operand.vmem [shape: bf16[2,8,128], index: 1, kind: input, shape index: {}]   ;;  %s1903_s2 = inlined_call_operand.vmem [shape: f32[2,8,1], index: 2, kind: input, shape index: {}]   ;;  %s1904_s3 = inlined_call_operand.vmem [shape: f32[2,8,2048], index: 3, kind: output, shape index: {}]  }
   0x1   :  { %s1693_s14 = smov 0  }
   0x2 LB: > { %s25_s15 = sadd.s32 1, %s1662_s13  ;;  %p1479_p0 = scmp.ge.s32.totalorder %s1666_s14, 1  ;;  %s1666_s14 = sphi %s1693_s14, %s13_s14   ;;  %s1662_s13 = sphi %s1691_s13, %s1906_s13   ;;  %s1658_s12 = sphi %s1689_s12, %s1905_s12  }
   0x3   : > { %p27_p1 = scmp.ge.s32.totalorder %s25_s15, 2  ;;  %p176_p2 = scmp.lt.s32.totalorder %s1666_s14, 3 }
   0x5   : > { %s1908_s15 = smov (%p27_p1, %s25_s15), 0  ;;  %p177_p3 = pnand %p1479_p0, %p176_p2 }
   0x6   : > { %p217_p4 = scmp.lt.s32.totalorder (!%p177_p3), %s1658_s12, 1 }
   0x7   : > { %180 = sbr.rel (%p177_p3) target bundleno = 346 (0x15a), region = 32 }
   0xc   : > { %v1668_v0 = vmov 0   ;;  %s1910_s12 = smov (!%p217_p4, %s1658_s12), 1 }
   0xd   : > { %1052 = vmatprep.mubr.bf16.mxu0 %v1668_v0  ;;  %1093 = vmatprep.mubr.bf16.mxu1 %v1668_v0  ;;  %s1616_s16 = sshll.u32 %s1910_s12, 10  ;;  %s1482_s20 = sshll.u32 %s1910_s12, 2 }
   0xe   : > { %1643 = vset.pattern.permute.xlu0 %v1668_v0  ;;  %s1716_s19 = scalar_lea.vmem %s1901_s0, %s1616_s16  ;;  %s229_s23 = scalar_lea.vmem %s1902_s1, %s1482_s20 }
   0xf   : > { %v358_v1 = vld [vmem:[%s1716_s19 + $0x380] sm:$0xff]  ;;  %v359_v3 = vld [vmem:[%s1716_s19 + $0x388] sm:$0xff]  ;;  %v360_v63 = vld [vmem:[%s1716_s19 + $0x390] sm:$0xff]  ;;  %s1483_s24 = sshll.u32 %s1910_s12, 3  ;;  %s1617_s28 = sshll.u32 %s1910_s12, 7 }
  0x10   : > { %v366_v2 = vld [vmem:[%s1716_s19 + $0x3c0] sm:$0xff]  ;;  %v367_v5 = vld [vmem:[%s1716_s19 + $0x3c8] sm:$0xff]  ;;  %s233_s27 = scalar_lea.vmem %s1903_s2, %s1483_s24  ;;  %s1874_s4 = scalar_lea.vmem %s1904_s3, %s1617_s28 }
  0x11   : > { %v1599_v4 = vcombine.high %v358_v1, %v366_v2  ;;  %v1598_v6 = vcombine.low %v358_v1, %v366_v2  ;;  %v342_v7 = vld [vmem:[%s1716_s19 + $0x300] sm:$0xff]  ;;  %v1601_v9 = vcombine.high %v359_v3, %v367_v5  ;;  %v1600_v10 = vcombine.low %v359_v3, %v367_v5  ;;  %v343_v12 = vld [vmem:[%s1716_s19 + $0x308] sm:$0xff]  ;;  %v368_v1 = vld [vmem:[%s1716_s19 + $0x3d0] sm:$0xff] }
  0x12   : > { %v350_v8 = vld [vmem:[%s1716_s19 + $0x340] sm:$0xff]  ;;  %v351_v13 = vld [vmem:[%s1716_s19 + $0x348] sm:$0xff]  ;;  %v361_v2 = vld [vmem:[%s1716_s19 + $0x398] sm:$0xff] }
  0x13   : > { %v1583_v11 = vcombine.high %v342_v7, %v350_v8  ;;  %v326_v14 = vld [vmem:[%s1716_s19 + $0x280] sm:$0xff]  ;;  %1020 = vmatprep.subr.bf16.mxu0 %v1599_v4  ;;  %v1585_v15 = vcombine.high %v343_v12, %v351_v13  ;;  %v327_v17 = vld [vmem:[%s1716_s19 + $0x288] sm:$0xff]  ;;  %1061 = vmatprep.subr.bf16.mxu1 %v1601_v9  ;;  %v1582_v19 = vcombine.low %v342_v7, %v350_v8  ;;  %v369_v3 = vld [vmem:[%s1716_s19 + $0x3d8] sm:$0xff] }
  0x14   : > { %v334_v16 = vld [vmem:[%s1716_s19 + $0x2c0] sm:$0xff]  ;;  %v335_v18 = vld [vmem:[%s1716_s19 + $0x2c8] sm:$0xff]  ;;  %1021 = vmatpush1.bf16.msra.mxu0 %v1598_v6  ;;  %1062 = vmatpush1.bf16.msra.mxu1 %v1600_v10  ;;  %v1584_v20 = vcombine.low %v343_v12, %v351_v13  ;;  %v1603_v6 = vcombine.high %v360_v63, %v368_v1  ;;  %v1605_v7 = vcombine.high %v361_v2, %v369_v3  ;;  %v344_v8 = vld [vmem:[%s1716_s19 + $0x310] sm:$0xff] }
  0x15   : > { %1022 = vmatprep.subr.bf16.mxu0 %v1583_v11  ;;  %v1567_v21 = vcombine.high %v326_v14, %v334_v16  ;;  %1063 = vmatprep.subr.bf16.mxu1 %v1585_v15  ;;  %v1569_v22 = vcombine.high %v327_v17, %v335_v18  ;;  %v310_v23 = vld [vmem:[%s1716_s19 + $0x200] sm:$0xff]  ;;  %v311_v25 = vld [vmem:[%s1716_s19 + $0x208] sm:$0xff]  ;;  %v1566_v27 = vcombine.low %v326_v14, %v334_v16  ;;  %v352_v9 = vld [vmem:[%s1716_s19 + $0x350] sm:$0xff] }
  0x16   : > { %v318_v24 = vld [vmem:[%s1716_s19 + $0x240] sm:$0xff]  ;;  %v319_v26 = vld [vmem:[%s1716_s19 + $0x248] sm:$0xff]  ;;  %v1568_v28 = vcombine.low %v327_v17, %v335_v18  ;;  %v345_v10 = vld [vmem:[%s1716_s19 + $0x318] sm:$0xff]  ;;  %v1602_v13 = vcombine.low %v360_v63, %v368_v1  ;;  %v1604_v14 = vcombine.low %v361_v2, %v369_v3  ;;  %v1587_v15 = vcombine.high %v344_v8, %v352_v9 }
  0x17   : > { %v1551_v29 = vcombine.high %v310_v23, %v318_v24  ;;  %v1553_v30 = vcombine.high %v311_v25, %v319_v26  ;;  %v294_v31 = vld [vmem:[%s1716_s19 + $0x180] sm:$0xff]  ;;  %v295_v33 = vld [vmem:[%s1716_s19 + $0x188] sm:$0xff]  ;;  %v1550_v35 = vcombine.low %v310_v23, %v318_v24  ;;  %v1552_v36 = vcombine.low %v311_v25, %v319_v26  ;;  %v353_v11 = vld [vmem:[%s1716_s19 + $0x358] sm:$0xff] }
  0x18   : > { %1023 = vmatpush1.bf16.msra.mxu0 %v1582_v19  ;;  %1064 = vmatpush1.bf16.msra.mxu1 %v1584_v20  ;;  %v302_v32 = vld [vmem:[%s1716_s19 + $0x1c0] sm:$0xff]  ;;  %v303_v34 = vld [vmem:[%s1716_s19 + $0x1c8] sm:$0xff]  ;;  %v1589_v16 = vcombine.high %v345_v10, %v353_v11  ;;  %v328_v17 = vld [vmem:[%s1716_s19 + $0x290] sm:$0xff]  ;;  %v1588_v23 = vcombine.low %v345_v10, %v353_v11 }
  0x19   : > { %1024 = vmatprep.subr.bf16.mxu0 %v1567_v21  ;;  %1065 = vmatprep.subr.bf16.mxu1 %v1569_v22  ;;  %v1535_v37 = vcombine.high %v294_v31, %v302_v32  ;;  %v1537_v38 = vcombine.high %v295_v33, %v303_v34  ;;  %v278_v39 = vld [vmem:[%s1716_s19 + $0x100] sm:$0xff]  ;;  %v279_v41 = vld [vmem:[%s1716_s19 + $0x108] sm:$0xff]  ;;  %v1534_v43 = vcombine.low %v294_v31, %v302_v32  ;;  %v336_v18 = vld [vmem:[%s1716_s19 + $0x2d0] sm:$0xff] }
  0x1a   : > { %v286_v40 = vld [vmem:[%s1716_s19 + $0x140] sm:$0xff]  ;;  %v287_v42 = vld [vmem:[%s1716_s19 + $0x148] sm:$0xff]  ;;  %v1536_v44 = vcombine.low %v295_v33, %v303_v34  ;;  %v329_v19 = vld [vmem:[%s1716_s19 + $0x298] sm:$0xff]  ;;  %v1586_v21 = vcombine.low %v344_v8, %v352_v9  ;;  %v1571_v24 = vcombine.high %v328_v17, %v336_v18 }
  0x1b   : > { %v1519_v45 = vcombine.high %v278_v39, %v286_v40  ;;  %v1521_v46 = vcombine.high %v279_v41, %v287_v42  ;;  %v262_v47 = vld [vmem:[%s1716_s19 + $0x80] sm:$0xff]  ;;  %v263_v49 = vld [vmem:[%s1716_s19 + $0x88] sm:$0xff]  ;;  %v1518_v51 = vcombine.low %v278_v39, %v286_v40  ;;  %v1520_v52 = vcombine.low %v279_v41, %v287_v42  ;;  %v337_v20 = vld [vmem:[%s1716_s19 + $0x2d8] sm:$0xff] }
  0x1c   : > { %1025 = vmatpush1.bf16.msra.mxu0 %v1566_v27  ;;  %1066 = vmatpush1.bf16.msra.mxu1 %v1568_v28  ;;  %v270_v48 = vld [vmem:[%s1716_s19 + $0xc0] sm:$0xff]  ;;  %v271_v50 = vld [vmem:[%s1716_s19 + $0xc8] sm:$0xff]  ;;  %v1573_v25 = vcombine.high %v329_v19, %v337_v20  ;;  %v312_v26 = vld [vmem:[%s1716_s19 + $0x210] sm:$0xff]  ;;  %v1572_v31 = vcombine.low %v329_v19, %v337_v20 }
  0x1d   : > { %1026 = vmatprep.subr.bf16.mxu0 %v1551_v29  ;;  %1067 = vmatprep.subr.bf16.mxu1 %v1553_v30  ;;  %v1503_v53 = vcombine.high %v262_v47, %v270_v48  ;;  %v1505_v54 = vcombine.high %v263_v49, %v271_v50  ;;  %v246_v55 = vld [vmem:[%s1716_s19] sm:$0xff]  ;;  %v247_v57 = vld [vmem:[%s1716_s19 + $0x8] sm:$0xff]  ;;  %v1502_v59 = vcombine.low %v262_v47, %v270_v48  ;;  %v320_v27 = vld [vmem:[%s1716_s19 + $0x250] sm:$0xff] }
  0x1e   : > { %v254_v56 = vld [vmem:[%s1716_s19 + $0x40] sm:$0xff]  ;;  %v255_v58 = vld [vmem:[%s1716_s19 + $0x48] sm:$0xff]  ;;  %v1504_v60 = vcombine.low %v263_v49, %v271_v50  ;;  %v313_v28 = vld [vmem:[%s1716_s19 + $0x218] sm:$0xff]  ;;  %v1570_v30 = vcombine.low %v328_v17, %v336_v18  ;;  %v1555_v32 = vcombine.high %v312_v26, %v320_v27 }
  0x1f   : > { %v1487_v61 = vcombine.high %v246_v55, %v254_v56  ;;  %v1489_v62 = vcombine.high %v247_v57, %v255_v58  ;;  %v1486_v4 = vcombine.low %v246_v55, %v254_v56  ;;  %v1488_v5 = vcombine.low %v247_v57, %v255_v58  ;;  %v1763_v12 = vld [vmem:[%s229_s23] sm:$0xf]  ;;  %v321_v29 = vld [vmem:[%s1716_s19 + $0x258] sm:$0xff]  ;;  %v296_v34 = vld [vmem:[%s1716_s19 + $0x190] sm:$0xff] }
  0x20   : > { %1027 = vmatpush1.bf16.msra.mxu0 %v1550_v35  ;;  %1068 = vmatpush1.bf16.msra.mxu1 %v1552_v36  ;;  %v374_v22 = vld [vmem:[%s233_s27] sm:$0xff]  ;;  %v1557_v33 = vcombine.high %v313_v28, %v321_v29  ;;  %v304_v35 = vld [vmem:[%s1716_s19 + $0x1d0] sm:$0xff]  ;;  %v297_v36 = vld [vmem:[%s1716_s19 + $0x198] sm:$0xff]  ;;  %v1556_v39 = vcombine.low %v313_v28, %v321_v29 }
  0x21   : > { %1028 = vmatprep.subr.bf16.mxu0 %v1535_v37  ;;  %1069 = vmatprep.subr.bf16.mxu1 %v1537_v38  ;;  %v305_v37 = vld [vmem:[%s1716_s19 + $0x1d8] sm:$0xff]  ;;  %v1554_v38 = vcombine.low %v312_v26, %v320_v27  ;;  %v1539_v40 = vcombine.high %v296_v34, %v304_v35  ;;  %v280_v42 = vld [vmem:[%s1716_s19 + $0x110] sm:$0xff]  ;;  %v362_v3 = vld [vmem:[%s1716_s19 + $0x3a0] sm:$0xff] }
  0x22   : > { %377 = vperm.xlu0 %1643, %v374_v22   ;;  %v1541_v41 = vcombine.high %v297_v36, %v305_v37  ;;  %v1540_v47 = vcombine.low %v297_v36, %v305_v37  ;;  %v264_v50 = vld [vmem:[%s1716_s19 + $0x90] sm:$0xff]  ;;  %v346_v11 = vld [vmem:[%s1716_s19 + $0x320] sm:$0xff]  ;;  %v331_v22 = vld [vmem:[%s1716_s19 + $0x2a8] sm:$0xff] }
  0x23   : > { %v248_v58 = vld [vmem:[%s1716_s19 + $0x10] sm:$0xff]  ;;  %v330_v20 = vld [vmem:[%s1716_s19 + $0x2a0] sm:$0xff] }
  0x24   : > { %1029 = vmatpush1.bf16.msra.mxu0 %v1534_v43  ;;  %1070 = vmatpush1.bf16.msra.mxu1 %v1536_v44  ;;  %v288_v43 = vld [vmem:[%s1716_s19 + $0x150] sm:$0xff]  ;;  %v281_v44 = vld [vmem:[%s1716_s19 + $0x118] sm:$0xff]  ;;  %v314_v28 = vld [vmem:[%s1716_s19 + $0x220] sm:$0xff] }
  0x25   : > { %1030 = vmatprep.subr.bf16.mxu0 %v1519_v45  ;;  %1071 = vmatprep.subr.bf16.mxu1 %v1521_v46  ;;  %v289_v45 = vld [vmem:[%s1716_s19 + $0x158] sm:$0xff]  ;;  %v1538_v46 = vcombine.low %v296_v34, %v304_v35  ;;  %v1523_v48 = vcombine.high %v280_v42, %v288_v43  ;;  %v322_v29 = vld [vmem:[%s1716_s19 + $0x260] sm:$0xff] }
  0x26   : > { %v1525_v49 = vcombine.high %v281_v44, %v289_v45  ;;  %v1524_v55 = vcombine.low %v281_v44, %v289_v45  ;;  %v1559_v34 = vcombine.high %v314_v28, %v322_v29  ;;  %v298_v36 = vld [vmem:[%s1716_s19 + $0x1a0] sm:$0xff] }
  0x27   : > { %v306_v37 = vld [vmem:[%s1716_s19 + $0x1e0] sm:$0xff] }
  0x28   : > { %1031 = vmatpush1.bf16.msra.mxu0 %v1518_v51  ;;  %1072 = vmatpush1.bf16.msra.mxu1 %v1520_v52  ;;  %v272_v51 = vld [vmem:[%s1716_s19 + $0xd0] sm:$0xff]  ;;  %v265_v52 = vld [vmem:[%s1716_s19 + $0x98] sm:$0xff]  ;;  %v282_v44 = vld [vmem:[%s1716_s19 + $0x120] sm:$0xff] }
  0x29   : > { %1032 = vmatprep.subr.bf16.mxu0 %v1503_v53  ;;  %1073 = vmatprep.subr.bf16.mxu1 %v1505_v54  ;;  %v273_v53 = vld [vmem:[%s1716_s19 + $0xd8] sm:$0xff]  ;;  %v1522_v54 = vcombine.low %v280_v42, %v288_v43  ;;  %v1507_v56 = vcombine.high %v264_v50, %v272_v51  ;;  %v1543_v42 = vcombine.high %v298_v36, %v306_v37  ;;  %v290_v45 = vld [vmem:[%s1716_s19 + $0x160] sm:$0xff] }
  0x2a   : > { %v1509_v57 = vcombine.high %v265_v52, %v273_v53  ;;  %v1508_v63 = vcombine.low %v265_v52, %v273_v53  ;;  %v266_v52 = vld [vmem:[%s1716_s19 + $0xa0] sm:$0xff] }
  0x2b   : > { %v274_v53 = vld [vmem:[%s1716_s19 + $0xe0] sm:$0xff] }
  0x2c   : > { %1033 = vmatpush1.bf16.msra.mxu0 %v1502_v59  ;;  %1074 = vmatpush1.bf16.msra.mxu1 %v1504_v60  ;;  %v256_v59 = vld [vmem:[%s1716_s19 + $0x50] sm:$0xff]  ;;  %v249_v60 = vld [vmem:[%s1716_s19 + $0x18] sm:$0xff] }
  0x2d   : > { %1034 = vmatprep.subr.bf16.mxu0 %v1487_v61  ;;  %1075 = vmatprep.subr.bf16.mxu1 %v1489_v62  ;;  %v257_v61 = vld [vmem:[%s1716_s19 + $0x58] sm:$0xff]  ;;  %v1506_v62 = vcombine.low %v264_v50, %v272_v51  ;;  %v1491_v1 = vcombine.high %v248_v58, %v256_v59  ;;  %v1527_v50 = vcombine.high %v282_v44, %v290_v45 }
  0x2e   : > { %v1493_v2 = vcombine.high %v249_v60, %v257_v61  ;;  %v1492_v8 = vcombine.low %v249_v60, %v257_v61  ;;  %v250_v60 = vld [vmem:[%s1716_s19 + $0x20] sm:$0xff] }
  0x2f   : > { %v258_v61 = vld [vmem:[%s1716_s19 + $0x60] sm:$0xff] }
  0x30   : > { %1035 = vmatpush1.bf16.msra.mxu0 %v1486_v4  ;;  %1076 = vmatpush1.bf16.msra.mxu1 %v1488_v5  ;;  %v370_v4 = vld [vmem:[%s1716_s19 + $0x3e0] sm:$0xff]  ;;  %v363_v5 = vld [vmem:[%s1716_s19 + $0x3a8] sm:$0xff] }
  0x31   : > { %1102 = vmatprep.subr.bf16.mxu0 %v1603_v6  ;;  %1143 = vmatprep.subr.bf16.mxu1 %v1605_v7  ;;  %v371_v6 = vld [vmem:[%s1716_s19 + $0x3e8] sm:$0xff]  ;;  %v1490_v7 = vcombine.low %v248_v58, %v256_v59  ;;  %v1607_v9 = vcombine.high %v362_v3, %v370_v4  ;;  %v1511_v58 = vcombine.high %v266_v52, %v274_v53 }
  0x32   : > { %v1609_v10 = vcombine.high %v363_v5, %v371_v6  ;;  %v1608_v17 = vcombine.low %v363_v5, %v371_v6  ;;  %v364_v5 = vld [vmem:[%s1716_s19 + $0x3b0] sm:$0xff] }
  0x33   : > { %1053 = vmatmul.mubr.bf16.vlgmr.msra.gmra.mxu0 %v1763_v12  ;;  %1094 = vmatmul.mubr.bf16.vlgmr.msra.gmra.mxu1 %v1763_v12  ;;  %v372_v6 = vld [vmem:[%s1716_s19 + $0x3f0] sm:$0xff] }
  0x34   : > { %1103 = vmatpush1.bf16.msra.mxu0 %v1602_v13  ;;  %1144 = vmatpush1.bf16.msra.mxu1 %v1604_v14  ;;  %v354_v13 = vld [vmem:[%s1716_s19 + $0x360] sm:$0xff]  ;;  %v347_v14 = vld [vmem:[%s1716_s19 + $0x328] sm:$0xff] }
  0x35   : > { %1104 = vmatprep.subr.bf16.mxu0 %v1587_v15  ;;  %1145 = vmatprep.subr.bf16.mxu1 %v1589_v16  ;;  %v355_v15 = vld [vmem:[%s1716_s19 + $0x368] sm:$0xff]  ;;  %v1606_v16 = vcombine.low %v362_v3, %v370_v4  ;;  %v1591_v18 = vcombine.high %v346_v11, %v354_v13  ;;  %v1495_v3 = vcombine.high %v250_v60, %v258_v61 }
  0x36   : > { %1134 = vmatprep.mubr.bf16.mxu0 %v1668_v0  ;;  %1175 = vmatprep.mubr.bf16.mxu1 %v1668_v0  ;;  %v1593_v19 = vcombine.high %v347_v14, %v355_v15 }
  0x38   : > { %1105 = vmatpush1.bf16.msra.mxu0 %v1586_v21  ;;  %1146 = vmatpush1.bf16.msra.mxu1 %v1588_v23  ;;  %v338_v21 = vld [vmem:[%s1716_s19 + $0x2e0] sm:$0xff]  ;;  %v339_v23 = vld [vmem:[%s1716_s19 + $0x2e8] sm:$0xff] }
  0x39   : > { %1106 = vmatprep.subr.bf16.mxu0 %v1571_v24  ;;  %1147 = vmatprep.subr.bf16.mxu1 %v1573_v25  ;;  %v1590_v24 = vcombine.low %v346_v11, %v354_v13  ;;  %v1592_v25 = vcombine.low %v347_v14, %v355_v15  ;;  %v1575_v26 = vcombine.high %v330_v20, %v338_v21  ;;  %v348_v14 = vld [vmem:[%s1716_s19 + $0x330] sm:$0xff] }
  0x3a   : > { %v1577_v27 = vcombine.high %v331_v22, %v339_v23  ;;  %v1611_v11 = vcombine.high %v364_v5, %v372_v6  ;;  %v356_v15 = vld [vmem:[%s1716_s19 + $0x370] sm:$0xff] }
  0x3c   : > { %1107 = vmatpush1.bf16.msra.mxu0 %v1570_v30  ;;  %1148 = vmatpush1.bf16.msra.mxu1 %v1572_v31  ;;  %v315_v30 = vld [vmem:[%s1716_s19 + $0x228] sm:$0xff] }
  0x3d   : > { %1108 = vmatprep.subr.bf16.mxu0 %v1555_v32  ;;  %1149 = vmatprep.subr.bf16.mxu1 %v1557_v33  ;;  %v323_v31 = vld [vmem:[%s1716_s19 + $0x268] sm:$0xff]  ;;  %v1574_v32 = vcombine.low %v330_v20, %v338_v21  ;;  %v1576_v33 = vcombine.low %v331_v22, %v339_v23  ;;  %v1595_v20 = vcombine.high %v348_v14, %v356_v15  ;;  %v332_v22 = vld [vmem:[%s1716_s19 + $0x2b0] sm:$0xff] }
  0x3e   : > { %v1561_v35 = vcombine.high %v315_v30, %v323_v31  ;;  %v340_v23 = vld [vmem:[%s1716_s19 + $0x2f0] sm:$0xff] }
  0x40   : > { %1109 = vmatpush1.bf16.msra.mxu0 %v1554_v38  ;;  %1150 = vmatpush1.bf16.msra.mxu1 %v1556_v39  ;;  %v299_v38 = vld [vmem:[%s1716_s19 + $0x1a8] sm:$0xff] }
  0x41   : > { %1110 = vmatprep.subr.bf16.mxu0 %v1539_v40  ;;  %1151 = vmatprep.subr.bf16.mxu1 %v1541_v41  ;;  %v307_v39 = vld [vmem:[%s1716_s19 + $0x1e8] sm:$0xff]  ;;  %v1558_v40 = vcombine.low %v314_v28, %v322_v29  ;;  %v1560_v41 = vcombine.low %v315_v30, %v323_v31  ;;  %v1579_v28 = vcombine.high %v332_v22, %v340_v23  ;;  %v316_v30 = vld [vmem:[%s1716_s19 + $0x230] sm:$0xff] }
  0x42   : > { %v1545_v43 = vcombine.high %v299_v38, %v307_v39  ;;  %v324_v31 = vld [vmem:[%s1716_s19 + $0x270] sm:$0xff] }
  0x44   : > { %1111 = vmatpush1.bf16.msra.mxu0 %v1538_v46  ;;  %1152 = vmatpush1.bf16.msra.mxu1 %v1540_v47  ;;  %v283_v46 = vld [vmem:[%s1716_s19 + $0x128] sm:$0xff] }
  0x45   : > { %1112 = vmatprep.subr.bf16.mxu0 %v1523_v48  ;;  %1153 = vmatprep.subr.bf16.mxu1 %v1525_v49  ;;  %v291_v47 = vld [vmem:[%s1716_s19 + $0x168] sm:$0xff]  ;;  %v1542_v48 = vcombine.low %v298_v36, %v306_v37  ;;  %v1544_v49 = vcombine.low %v299_v38, %v307_v39  ;;  %v1563_v36 = vcombine.high %v316_v30, %v324_v31  ;;  %v300_v38 = vld [vmem:[%s1716_s19 + $0x1b0] sm:$0xff] }
  0x46   : > { %v1529_v51 = vcombine.high %v283_v46, %v291_v47  ;;  %v308_v39 = vld [vmem:[%s1716_s19 + $0x1f0] sm:$0xff] }
  0x48   : > { %1113 = vmatpush1.bf16.msra.mxu0 %v1522_v54  ;;  %1154 = vmatpush1.bf16.msra.mxu1 %v1524_v55  ;;  %v267_v54 = vld [vmem:[%s1716_s19 + $0xa8] sm:$0xff] }
  0x49   : > { %1114 = vmatprep.subr.bf16.mxu0 %v1507_v56  ;;  %1155 = vmatprep.subr.bf16.mxu1 %v1509_v57  ;;  %v275_v55 = vld [vmem:[%s1716_s19 + $0xe8] sm:$0xff]  ;;  %v1526_v56 = vcombine.low %v282_v44, %v290_v45  ;;  %v1528_v57 = vcombine.low %v283_v46, %v291_v47  ;;  %v284_v45 = vld [vmem:[%s1716_s19 + $0x130] sm:$0xff]  ;;  %v285_v47 = vld [vmem:[%s1716_s19 + $0x138] sm:$0xff] }
  0x4a   : > { %v1513_v59 = vcombine.high %v267_v54, %v275_v55  ;;  %v292_v46 = vld [vmem:[%s1716_s19 + $0x170] sm:$0xff] }
  0x4c   : > { %1115 = vmatpush1.bf16.msra.mxu0 %v1506_v62  ;;  %1156 = vmatpush1.bf16.msra.mxu1 %v1508_v63  ;;  %v251_v62 = vld [vmem:[%s1716_s19 + $0x28] sm:$0xff] }
  0x4d   : > { %1116 = vmatprep.subr.bf16.mxu0 %v1491_v1  ;;  %1157 = vmatprep.subr.bf16.mxu1 %v1493_v2  ;;  %v259_v63 = vld [vmem:[%s1716_s19 + $0x68] sm:$0xff]  ;;  %v1510_v1 = vcombine.low %v266_v52, %v274_v53  ;;  %v1512_v2 = vcombine.low %v267_v54, %v275_v55  ;;  %v268_v53 = vld [vmem:[%s1716_s19 + $0xb0] sm:$0xff]  ;;  %v269_v55 = vld [vmem:[%s1716_s19 + $0xb8] sm:$0xff] }
  0x4e   : > { %v1497_v4 = vcombine.high %v251_v62, %v259_v63  ;;  %v276_v54 = vld [vmem:[%s1716_s19 + $0xf0] sm:$0xff] }
  0x50   : > { %1117 = vmatpush1.bf16.msra.mxu0 %v1490_v7  ;;  %1158 = vmatpush1.bf16.msra.mxu1 %v1492_v8  ;;  %v365_v7 = vld [vmem:[%s1716_s19 + $0x3b8] sm:$0xff] }
  0x51   : > { %1184 = vmatprep.subr.bf16.mxu0 %v1607_v9  ;;  %1225 = vmatprep.subr.bf16.mxu1 %v1609_v10  ;;  %v373_v8 = vld [vmem:[%s1716_s19 + $0x3f8] sm:$0xff]  ;;  %v1494_v9 = vcombine.low %v250_v60, %v258_v61  ;;  %v1496_v10 = vcombine.low %v251_v62, %v259_v63  ;;  %v252_v61 = vld [vmem:[%s1716_s19 + $0x30] sm:$0xff] }
  0x52   : > { %v1613_v13 = vcombine.high %v365_v7, %v373_v8  ;;  %v260_v62 = vld [vmem:[%s1716_s19 + $0x70] sm:$0xff]  ;;  %v253_v63 = vld [vmem:[%s1716_s19 + $0x38] sm:$0xff] }
  0x53   : > { %1135 = vmatmul.mubr.bf16.vlgmr.msra.gmra.mxu0 %v1763_v12  ;;  %1176 = vmatmul.mubr.bf16.vlgmr.msra.gmra.mxu1 %v1763_v12 }
  0x54   : > { %1185 = vmatpush1.bf16.msra.mxu0 %v1606_v16  ;;  %1226 = vmatpush1.bf16.msra.mxu1 %v1608_v17  ;;  %v349_v16 = vld [vmem:[%s1716_s19 + $0x338] sm:$0xff] }
  0x55   : > { %1186 = vmatprep.subr.bf16.mxu0 %v1591_v18  ;;  %1227 = vmatprep.subr.bf16.mxu1 %v1593_v19  ;;  %v357_v17 = vld [vmem:[%s1716_s19 + $0x378] sm:$0xff]  ;;  %v1610_v18 = vcombine.low %v364_v5, %v372_v6  ;;  %v1612_v19 = vcombine.low %v365_v7, %v373_v8  ;;  %v1498_v6 = vcombine.low %v252_v61, %v260_v62 }
  0x56   : > { %1216 = vmatprep.mubr.bf16.mxu0 %v1668_v0  ;;  %1257 = vmatprep.mubr.bf16.mxu1 %v1668_v0  ;;  %v1597_v21 = vcombine.high %v349_v16, %v357_v17 }
  0x58   : > { %1187 = vmatpush1.bf16.msra.mxu0 %v1590_v24  ;;  %1228 = vmatpush1.bf16.msra.mxu1 %v1592_v25  ;;  %v333_v24 = vld [vmem:[%s1716_s19 + $0x2b8] sm:$0xff] }
  0x59   : > { %1188 = vmatprep.subr.bf16.mxu0 %v1575_v26  ;;  %1229 = vmatprep.subr.bf16.mxu1 %v1577_v27  ;;  %v341_v25 = vld [vmem:[%s1716_s19 + $0x2f8] sm:$0xff]  ;;  %v1594_v26 = vcombine.low %v348_v14, %v356_v15  ;;  %v1596_v27 = vcombine.low %v349_v16, %v357_v17 }
  0x5a   : > { %v1581_v29 = vcombine.high %v333_v24, %v341_v25 }
  0x5c   : > { %1189 = vmatpush1.bf16.msra.mxu0 %v1574_v32  ;;  %1230 = vmatpush1.bf16.msra.mxu1 %v1576_v33  ;;  %v317_v32 = vld [vmem:[%s1716_s19 + $0x238] sm:$0xff] }
  0x5d   : > { %1190 = vmatprep.subr.bf16.mxu0 %v1559_v34  ;;  %1231 = vmatprep.subr.bf16.mxu1 %v1561_v35  ;;  %v325_v33 = vld [vmem:[%s1716_s19 + $0x278] sm:$0xff]  ;;  %v1578_v34 = vcombine.low %v332_v22, %v340_v23  ;;  %v1580_v35 = vcombine.low %v333_v24, %v341_v25 }
  0x5e   : > { %v1565_v37 = vcombine.high %v317_v32, %v325_v33 }
  0x60   : > { %1191 = vmatpush1.bf16.msra.mxu0 %v1558_v40  ;;  %1232 = vmatpush1.bf16.msra.mxu1 %v1560_v41  ;;  %v301_v40 = vld [vmem:[%s1716_s19 + $0x1b8] sm:$0xff] }
  0x61   : > { %1192 = vmatprep.subr.bf16.mxu0 %v1543_v42  ;;  %1233 = vmatprep.subr.bf16.mxu1 %v1545_v43  ;;  %v309_v41 = vld [vmem:[%s1716_s19 + $0x1f8] sm:$0xff]  ;;  %v1562_v42 = vcombine.low %v316_v30, %v324_v31  ;;  %v1547_v43 = vcombine.high %v300_v38, %v308_v39 }
  0x62   : > { %v1549_v44 = vcombine.high %v301_v40, %v309_v41 }
  0x64   : > { %1193 = vmatpush1.bf16.msra.mxu0 %v1542_v48  ;;  %1234 = vmatpush1.bf16.msra.mxu1 %v1544_v49  ;;  %v293_v48 = vld [vmem:[%s1716_s19 + $0x178] sm:$0xff]  ;;  %v1546_v49 = vcombine.low %v300_v38, %v308_v39 }
  0x65   : > { %1194 = vmatprep.subr.bf16.mxu0 %v1527_v50  ;;  %1235 = vmatprep.subr.bf16.mxu1 %v1529_v51  ;;  %v1548_v50 = vcombine.low %v301_v40, %v309_v41  ;;  %v1531_v51 = vcombine.high %v284_v45, %v292_v46  ;;  %v1533_v52 = vcombine.high %v285_v47, %v293_v48 }
  0x68   : > { %1195 = vmatpush1.bf16.msra.mxu0 %v1526_v56  ;;  %1236 = vmatpush1.bf16.msra.mxu1 %v1528_v57  ;;  %v277_v56 = vld [vmem:[%s1716_s19 + $0xf8] sm:$0xff]  ;;  %v1530_v57 = vcombine.low %v284_v45, %v292_v46 }
  0x69   : > { %1196 = vmatprep.subr.bf16.mxu0 %v1511_v58  ;;  %1237 = vmatprep.subr.bf16.mxu1 %v1513_v59  ;;  %v1532_v58 = vcombine.low %v285_v47, %v293_v48  ;;  %v1515_v59 = vcombine.high %v268_v53, %v276_v54  ;;  %v1517_v60 = vcombine.high %v269_v55, %v277_v56 }
  0x6c   : > { %1197 = vmatpush1.bf16.msra.mxu0 %v1510_v1  ;;  %1238 = vmatpush1.bf16.msra.mxu1 %v1512_v2  ;;  %v261_v1 = vld [vmem:[%s1716_s19 + $0x78] sm:$0xff]  ;;  %v1514_v2 = vcombine.low %v268_v53, %v276_v54 }
  0x6d   : > { %1198 = vmatprep.subr.bf16.mxu0 %v1495_v3  ;;  %1239 = vmatprep.subr.bf16.mxu1 %v1497_v4  ;;  %v1516_v3 = vcombine.low %v269_v55, %v277_v56  ;;  %v1499_v4 = vcombine.high %v252_v61, %v260_v62  ;;  %v1501_v5 = vcombine.high %v253_v63, %v261_v1 }
  0x6e   : > { %v1500_v7 = vcombine.low %v253_v63, %v261_v1 }
  0x70   : > { %1199 = vmatpush1.bf16.msra.mxu0 %v1494_v9  ;;  %1240 = vmatpush1.bf16.msra.mxu1 %v1496_v10 }
  0x71   : > { %1266 = vmatprep.subr.bf16.mxu0 %v1611_v11  ;;  %1307 = vmatprep.subr.bf16.mxu1 %v1613_v13 }
  0x73   : > { %1217 = vmatmul.mubr.bf16.vlgmr.msra.gmra.mxu0 %v1763_v12  ;;  %1258 = vmatmul.mubr.bf16.vlgmr.msra.gmra.mxu1 %v1763_v12 }
  0x74   : > { %1267 = vmatpush1.bf16.msra.mxu0 %v1610_v18  ;;  %1308 = vmatpush1.bf16.msra.mxu1 %v1612_v19 }
  0x75   : > { %1268 = vmatprep.subr.bf16.mxu0 %v1595_v20  ;;  %1309 = vmatprep.subr.bf16.mxu1 %v1597_v21 }
  0x76   : > { %1298 = vmatprep.mubr.bf16.mxu0 %v1668_v0  ;;  %1339 = vmatprep.mubr.bf16.mxu1 %v1668_v0  ;;  %v1564_v0 = vcombine.low %v317_v32, %v325_v33 }
  0x78   : > { %1269 = vmatpush1.bf16.msra.mxu0 %v1594_v26  ;;  %1310 = vmatpush1.bf16.msra.mxu1 %v1596_v27 }
  0x79   : > { %1270 = vmatprep.subr.bf16.mxu0 %v1579_v28  ;;  %1311 = vmatprep.subr.bf16.mxu1 %v1581_v29 }
  0x7c   : > { %1271 = vmatpush1.bf16.msra.mxu0 %v1578_v34  ;;  %1312 = vmatpush1.bf16.msra.mxu1 %v1580_v35 }
  0x7d   : > { %1272 = vmatprep.subr.bf16.mxu0 %v1563_v36  ;;  %1313 = vmatprep.subr.bf16.mxu1 %v1565_v37 }
  0x80   : > { %1273 = vmatpush1.bf16.msra.mxu0 %v1562_v42  ;;  %1314 = vmatpush1.bf16.msra.mxu1 %v1564_v0 }
  0x81   : > { %1274 = vmatprep.subr.bf16.mxu0 %v1547_v43  ;;  %1315 = vmatprep.subr.bf16.mxu1 %v1549_v44 }
  0x84   : > { %1275 = vmatpush1.bf16.msra.mxu0 %v1546_v49  ;;  %1316 = vmatpush1.bf16.msra.mxu1 %v1548_v50 }
  0x85   : > { %1276 = vmatprep.subr.bf16.mxu0 %v1531_v51  ;;  %1317 = vmatprep.subr.bf16.mxu1 %v1533_v52 }
  0x88   : > { %1277 = vmatpush1.bf16.msra.mxu0 %v1530_v57  ;;  %1318 = vmatpush1.bf16.msra.mxu1 %v1532_v58 }
  0x89   : > { %1278 = vmatprep.subr.bf16.mxu0 %v1515_v59  ;;  %1319 = vmatprep.subr.bf16.mxu1 %v1517_v60 }
  0x8c   : > { %1279 = vmatpush1.bf16.msra.mxu0 %v1514_v2  ;;  %1320 = vmatpush1.bf16.msra.mxu1 %v1516_v3 }
  0x8d   : > { %1280 = vmatprep.subr.bf16.mxu0 %v1499_v4  ;;  %1321 = vmatprep.subr.bf16.mxu1 %v1501_v5 }
  0x90   : > { %1281 = vmatpush1.bf16.msra.mxu0 %v1498_v6  ;;  %1322 = vmatpush1.bf16.msra.mxu1 %v1500_v7 }
  0x93   : > { %1299 = vmatmul.mubr.bf16.vlgmr.msra.gmra.mxu0 %v1763_v12  ;;  %1340 = vmatmul.mubr.bf16.vlgmr.msra.gmra.mxu1 %v1763_v12 }
  0x9d   : > { %v378_v8 = vpop.permute.xlu0 %377 }
  0xf3   : > { %v1054_v9 = vpop.f32.mrf.mxu0  ;;  %v1095_v10 = vpop.f32.mrf.mxu1 }
  0xf4   : > { %v1055_v11 = vadd.f32 %v1054_v9, %v378_v8  ;;  %v1096_v13 = vadd.f32 %v1095_v10, %v378_v8 }
  0xf5   : > { %v1056_v14 = vpop.f32.mrf.mxu0  ;;  %v1097_v12 = vpop.f32.mrf.mxu1 }
  0xf6   : > { %1348 = vst [vmem:[%s1874_s4] sm:$0xff] %v1055_v11  ;;  %v1057_v15 = vadd.f32 %v1056_v14, %v378_v8  ;;  %1350 = vst [vmem:[%s1874_s4 + $0x10] sm:$0xff] %v1096_v13  ;;  %v1098_v16 = vadd.f32 %v1097_v12, %v378_v8 }
  0xf7   : > { %v1058_v17 = vpop.f32.mrf.mxu0  ;;  %v1099_v18 = vpop.f32.mrf.mxu1 }
  0xf8   : > { %1349 = vst [vmem:[%s1874_s4 + $0x8] sm:$0xff] %v1057_v15  ;;  %1351 = vst [vmem:[%s1874_s4 + $0x18] sm:$0xff] %v1098_v16 }
  0xf9   : > { %v1059_v19 = vpop.f32.mrf.mxu0  ;;  %v1100_v20 = vpop.f32.mrf.mxu1 }
 0x113   : > { %v1136_v21 = vpop.f32.mrf.mxu0  ;;  %v1177_v23 = vpop.f32.mrf.mxu1 }
 0x114   : > { %v1137_v22 = vadd.f32 %v1136_v21, %v378_v8  ;;  %v1178_v24 = vadd.f32 %v1177_v23, %v378_v8 }
 0x115   : > { %v1138_v25 = vpop.f32.mrf.mxu0  ;;  %v1179_v27 = vpop.f32.mrf.mxu1 }
 0x116   : > { %1352 = vst [vmem:[%s1874_s4 + $0x20] sm:$0xff] %v1137_v22  ;;  %v1139_v26 = vadd.f32 %v1138_v25, %v378_v8  ;;  %1354 = vst [vmem:[%s1874_s4 + $0x30] sm:$0xff] %v1178_v24  ;;  %v1180_v28 = vadd.f32 %v1179_v27, %v378_v8 }
 0x117   : > { %v1140_v29 = vpop.f32.mrf.mxu0  ;;  %v1181_v30 = vpop.f32.mrf.mxu1 }
 0x118   : > { %1353 = vst [vmem:[%s1874_s4 + $0x28] sm:$0xff] %v1139_v26  ;;  %1355 = vst [vmem:[%s1874_s4 + $0x38] sm:$0xff] %v1180_v28 }
 0x119   : > { %v1141_v31 = vpop.f32.mrf.mxu0  ;;  %v1182_v32 = vpop.f32.mrf.mxu1 }
 0x133   : > { %v1218_v33 = vpop.f32.mrf.mxu0  ;;  %v1259_v35 = vpop.f32.mrf.mxu1 }
 0x134   : > { %v1219_v34 = vadd.f32 %v1218_v33, %v378_v8  ;;  %v1260_v36 = vadd.f32 %v1259_v35, %v378_v8 }
 0x135   : > { %v1220_v37 = vpop.f32.mrf.mxu0  ;;  %v1261_v39 = vpop.f32.mrf.mxu1 }
 0x136   : > { %1356 = vst [vmem:[%s1874_s4 + $0x40] sm:$0xff] %v1219_v34  ;;  %v1221_v38 = vadd.f32 %v1220_v37, %v378_v8  ;;  %1358 = vst [vmem:[%s1874_s4 + $0x50] sm:$0xff] %v1260_v36  ;;  %v1262_v40 = vadd.f32 %v1261_v39, %v378_v8 }
 0x137   : > { %v1222_v41 = vpop.f32.mrf.mxu0  ;;  %v1263_v42 = vpop.f32.mrf.mxu1 }
 0x138   : > { %1357 = vst [vmem:[%s1874_s4 + $0x48] sm:$0xff] %v1221_v38  ;;  %1359 = vst [vmem:[%s1874_s4 + $0x58] sm:$0xff] %v1262_v40 }
 0x139   : > { %v1223_v0 = vpop.f32.mrf.mxu0  ;;  %v1264_v43 = vpop.f32.mrf.mxu1 }
 0x153   : > { %v1300_v44 = vpop.f32.mrf.mxu0  ;;  %v1341_v46 = vpop.f32.mrf.mxu1 }
 0x154   : > { %v1301_v45 = vadd.f32 %v1300_v44, %v378_v8  ;;  %v1342_v47 = vadd.f32 %v1341_v46, %v378_v8 }
 0x155   : > { %v1302_v48 = vpop.f32.mrf.mxu0  ;;  %v1343_v50 = vpop.f32.mrf.mxu1 }
 0x156   : > { %1360 = vst [vmem:[%s1874_s4 + $0x60] sm:$0xff] %v1301_v45  ;;  %v1303_v49 = vadd.f32 %v1302_v48, %v378_v8  ;;  %1362 = vst [vmem:[%s1874_s4 + $0x70] sm:$0xff] %v1342_v47  ;;  %v1344_v51 = vadd.f32 %v1343_v50, %v378_v8 }
 0x157   : > { %v1304_v52 = vpop.f32.mrf.mxu0  ;;  %v1345_v53 = vpop.f32.mrf.mxu1 }
 0x158   : > { %1361 = vst [vmem:[%s1874_s4 + $0x68] sm:$0xff] %v1303_v49  ;;  %1363 = vst [vmem:[%s1874_s4 + $0x78] sm:$0xff] %v1344_v51 }
 0x159   : > { %v1305_v54 = vpop.f32.mrf.mxu0  ;;  %v1346_v55 = vpop.f32.mrf.mxu1 }
 0x15a PF: > { %s13_s14 = sadd.s32 1, %s1666_s14   ;;  %s1905_s12 = smov %s1662_s13 }
 0x15b   : > { %p10_p5 = scmp.ge.s32.totalorder %s13_s14, 4   ;;  %s1906_s13 = smov %s1908_s15 }
 0x15d   :  { %12 = sbr.rel (!%p10_p5) target bundleno = 2 (0x2), region = 68 }

</bundles_post_ra>
